<compile_context>
chip_gen: v7x
topology: tpu7x:2x2x1
jax: 0.10.0
libtpu: 0.0.40
codegen_flags: <defaults>
</compile_context>

<pallas_src>
import jax
import jax.numpy as jnp
from jax import lax
from jax.experimental import pallas as pl
from jax.experimental.pallas import tpu as pltpu


def _projection_head_kernel(lens_ref, x_ref, w1_ref, b1_ref, w2_ref, b2_ref,
                            o_ref, pool_ref):
    # lens_ref: (B, 1)  int32   valid point count per batch element (resident)
    # x_ref:    (B, TN, Cin)    current chunk of point features (all batches)
    # w1_ref:   (Cin, Cout)     b1_ref: (1, Cout)
    # w2_ref:   (Cout, Cout)    b2_ref: (1, Cout)
    # o_ref:    (B, Cout)       written once, on the last reduction step
    # pool_ref: (B, Cin) f32    VMEM scratch: running global max accumulator
    k = pl.program_id(0)

    @pl.when(k == 0)
    def _init():
        pool_ref[...] = jnp.full(pool_ref.shape, -jnp.inf, pool_ref.dtype)

    x = x_ref[...]                                    # (B, TN, Cin)
    b_dim, tn, cin = x.shape
    # Global row index of every point in this chunk; rows >= lens[b] are
    # padding (this also masks any out-of-bounds rows of a partial last chunk,
    # since lens[b] <= N).
    row = k * tn + lax.broadcasted_iota(jnp.int32, (b_dim, tn, cin), 1)
    valid = row < lens_ref[...][:, :, None]           # (B,1,1) -> (B,TN,Cin)
    xm = jnp.where(valid, x, -jnp.inf)
    pool_ref[...] = jnp.maximum(pool_ref[...], jnp.max(xm, axis=1))

    # Finalize: one batched 2-layer MLP on the pooled (B, Cin) matrix.
    @pl.when(k == pl.num_programs(0) - 1)
    def _finalize():
        pooled = pool_ref[...]                        # (B, Cin)
        h = jnp.dot(pooled, w1_ref[...],
                    preferred_element_type=jnp.float32) + b1_ref[...]
        h = jnp.maximum(h, 0.0)                       # ReLU
        out = jnp.dot(h, w2_ref[...],
                      preferred_element_type=jnp.float32) + b2_ref[...]
        o_ref[...] = out.astype(o_ref.dtype)          # one (B, Cout) store


def projection_head(x, lens, w1, b1, w2, b2, *, tile_n=512):
    """x: (B, N, Cin) f32, lens: (B,) int32 valid counts -> (B, Cout) f32."""
    B, N, Cin = x.shape
    Cout = w1.shape[1]

    lens2 = lens.reshape(B, 1).astype(jnp.int32)
    b1 = b1.reshape(1, Cout)
    b2 = b2.reshape(1, Cout)

    # Sublane-aligned chunk of the points axis; full N if it already fits.
    if N <= tile_n:
        tn = N
    else:
        tn = max(8, (tile_n // 8) * 8)
    grid_n = pl.cdiv(N, tn)

    cost = pl.CostEstimate(
        flops=2 * B * (Cin * Cout + Cout * Cout),
        transcendentals=0,
        bytes_accessed=(x.size + w1.size + w2.size
                        + 2 * Cout + B * Cout + 2 * B) * 4,
    )

    return pl.pallas_call(
        _projection_head_kernel,
        out_shape=jax.ShapeDtypeStruct((B, Cout), jnp.float32),
        grid_spec=pltpu.PrefetchScalarGridSpec(
            num_scalar_prefetch=0,
            grid=(grid_n,),                                   # N-reduction axis
            in_specs=[
                pl.BlockSpec((B, 1), lambda k: (0, 0)),       # lens (resident)
                pl.BlockSpec((B, tn, Cin), lambda k: (0, k, 0)),  # x chunk
                pl.BlockSpec((Cin, Cout), lambda k: (0, 0)),  # w1 (resident)
                pl.BlockSpec((1, Cout), lambda k: (0, 0)),    # b1 (resident)
                pl.BlockSpec((Cout, Cout), lambda k: (0, 0)), # w2 (resident)
                pl.BlockSpec((1, Cout), lambda k: (0, 0)),    # b2 (resident)
            ],
            out_specs=pl.BlockSpec((B, Cout), lambda k: (0, 0)),
            scratch_shapes=[pltpu.VMEM((B, Cin), jnp.float32)],
        ),
        compiler_params=pltpu.CompilerParams(
            dimension_semantics=("arbitrary",),   # reduction axis
            vmem_limit_bytes=32 * 1024 * 1024,    # safe on v5e/v6e/v7x
        ),
        cost_estimate=cost,
    )(lens2, x, w1, b1, w2, b2)


def reference(x, lens, w1, b1, w2, b2):
    N = x.shape[1]
    valid = jnp.arange(N)[None, :, None] < lens[:, None, None]
    pooled = jnp.max(jnp.where(valid, x, -jnp.inf), axis=1)
    h = jnp.maximum(pooled @ w1 + b1.reshape(1, -1), 0.0)
    return h @ w2 + b2.reshape(1, -1)


if __name__ == "__main__":
    # Small shapes consistent with the module: in_channels=32, out_channels=32,
    # batch=2, 64 points per batch element (batch 1 only has 40 real points).
    B, N, Cin, Cout = 2, 64, 32, 32

    key = jax.random.PRNGKey(0)
    kx, kw1, kb1, kw2, kb2 = jax.random.split(key, 5)

    x = jax.random.normal(kx, (B, N, Cin), dtype=jnp.float32)
    lens = jnp.array([N, 40], dtype=jnp.int32)
    # Poison the padded region of batch 1: the kernel must ignore it.
    x = x.at[1, 40:, :].set(100.0)

    # Deterministic PyTorch-Linear-style init: U(-1/sqrt(fan_in), 1/sqrt(fan_in)).
    # Weights stored as (in, out) so the kernel does x @ W (== x @ W_torch.T).
    bound1 = 1.0 / jnp.sqrt(jnp.float32(Cin))
    bound2 = 1.0 / jnp.sqrt(jnp.float32(Cout))
    w1 = jax.random.uniform(kw1, (Cin, Cout), jnp.float32, -bound1, bound1)
    b1 = jax.random.uniform(kb1, (Cout,), jnp.float32, -bound1, bound1)
    w2 = jax.random.uniform(kw2, (Cout, Cout), jnp.float32, -bound2, bound2)
    b2 = jax.random.uniform(kb2, (Cout,), jnp.float32, -bound2, bound2)

    # tile_n=16 -> 4 reduction steps, exercising the pipelined running-max path.
    out = projection_head(x, lens, w1, b1, w2, b2, tile_n=16)
    jax.block_until_ready(out)

    ref = reference(x, lens, w1, b1, w2, b2)
    assert out.shape == (B, Cout)
    assert jnp.allclose(out, ref, atol=1e-4, rtol=1e-4), "mismatch vs reference"

    print("KERNEL_OK")
</pallas_src>

<mosaic_0001>
module attributes {stable_mosaic.version = 11 : i64} {
  func.func @_projection_head_kernel(%arg0: i32, %arg1: memref<2x1xi32, #tpu.memory_space<vmem>>, %arg2: memref<2x16x32xf32, #tpu.memory_space<vmem>>, %arg3: memref<32x32xf32, #tpu.memory_space<vmem>>, %arg4: memref<1x32xf32, #tpu.memory_space<vmem>>, %arg5: memref<32x32xf32, #tpu.memory_space<vmem>>, %arg6: memref<1x32xf32, #tpu.memory_space<vmem>>, %arg7: memref<2x32xf32, #tpu.memory_space<vmem>>, %arg8: memref<2x32xf32, #tpu.memory_space<vmem>>) attributes {dimension_semantics = [#tpu.dimension_semantics<arbitrary>], iteration_bounds = array<i64: 4>, scalar_prefetch = 0 : i64, scratch_operands = 1 : i64, tpu.core_type = #tpu.core_type<tc>, window_params = [{pipeline_mode = #tpu.pipeline_mode<synchronous>, transform_indices = @transform_0, window_bounds = array<i64: 2, 1>}, {transform_indices = @transform_1, window_bounds = array<i64: 2, 16, 32>}, {pipeline_mode = #tpu.pipeline_mode<synchronous>, transform_indices = @transform_2, window_bounds = array<i64: 32, 32>}, {pipeline_mode = #tpu.pipeline_mode<synchronous>, transform_indices = @transform_3, window_bounds = array<i64: 1, 32>}, {pipeline_mode = #tpu.pipeline_mode<synchronous>, transform_indices = @transform_4, window_bounds = array<i64: 32, 32>}, {pipeline_mode = #tpu.pipeline_mode<synchronous>, transform_indices = @transform_5, window_bounds = array<i64: 1, 32>}, {pipeline_mode = #tpu.pipeline_mode<synchronous>, transform_indices = @transform_6, window_bounds = array<i64: 2, 32>}]} {
    %c0_i32 = arith.constant 0 : i32
    %0 = arith.cmpi eq, %arg0, %c0_i32 : i32
    %1 = arith.extui %0 : i1 to i32
    %c0_i32_0 = arith.constant 0 : i32
    %2 = arith.cmpi ne, %1, %c0_i32_0 : i32
    scf.if %2 {
      %cst_11 = arith.constant 0xFF800000 : f32
      %21 = vector.broadcast %cst_11 : f32 to vector<2x32xf32>
      %c0_12 = arith.constant 0 : index
      %c0_13 = arith.constant 0 : index
      %22 = vector.load %arg8[%c0_12, %c0_13] : memref<2x32xf32, #tpu.memory_space<vmem>>, vector<2x32xf32>
      tpu.vector_store %arg8[%c0_12, %c0_13], %21 {strides = array<i32>} : memref<2x32xf32, #tpu.memory_space<vmem>>, vector<2x32xf32>,
    } else {
    }
    %c0 = arith.constant 0 : index
    %c0_1 = arith.constant 0 : index
    %c0_2 = arith.constant 0 : index
    %3 = vector.load %arg2[%c0, %c0_1, %c0_2] : memref<2x16x32xf32, #tpu.memory_space<vmem>>, vector<2x16x32xf32>
    %c16_i32 = arith.constant 16 : i32
    %4 = arith.muli %arg0, %c16_i32 : i32
    %5 = tpu.iota {dimensions = array<i32: 1>} : vector<2x16x32xi32>
    %6 = vector.broadcast %4 : i32 to vector<2x16x32xi32>
    %7 = arith.addi %6, %5 : vector<2x16x32xi32>
    %c0_3 = arith.constant 0 : index
    %c0_4 = arith.constant 0 : index
    %8 = vector.load %arg1[%c0_3, %c0_4] : memref<2x1xi32, #tpu.memory_space<vmem>>, vector<2x1xi32>
    %9 = vector.shape_cast %8 : vector<2x1xi32> to vector<2x1x1xi32>
    %10 = vector.broadcast %9 : vector<2x1x1xi32> to vector<2x16x32xi32>
    %11 = arith.cmpi slt, %7, %10 : vector<2x16x32xi32>
    %cst = arith.constant 0xFF800000 : f32
    %12 = vector.broadcast %cst : f32 to vector<2x16x32xf32>
    %13 = arith.select %11, %3, %12 : vector<2x16x32xi1>, vector<2x16x32xf32>
    %c0_5 = arith.constant 0 : index
    %c0_6 = arith.constant 0 : index
    %14 = vector.load %arg8[%c0_5, %c0_6] : memref<2x32xf32, #tpu.memory_space<vmem>>, vector<2x32xf32>
    %cst_7 = arith.constant dense<0xFF800000> : vector<2x32xf32>
    %15 = vector.multi_reduction <maximumf>, %13, %cst_7 [1] : vector<2x16x32xf32> to vector<2x32xf32>
    %16 = arith.maximumf %14, %15 : vector<2x32xf32>
    %c0_8 = arith.constant 0 : index
    %c0_9 = arith.constant 0 : index
    %17 = vector.load %arg8[%c0_8, %c0_9] : memref<2x32xf32, #tpu.memory_space<vmem>>, vector<2x32xf32>
    tpu.vector_store %arg8[%c0_8, %c0_9], %16 {strides = array<i32>} : memref<2x32xf32, #tpu.memory_space<vmem>>, vector<2x32xf32>,
    %c3_i32 = arith.constant 3 : i32
    %18 = arith.cmpi eq, %arg0, %c3_i32 : i32
    %19 = arith.extui %18 : i1 to i32
    %c0_i32_10 = arith.constant 0 : i32
    %20 = arith.cmpi ne, %19, %c0_i32_10 : i32
    scf.if %20 {
      %c0_11 = arith.constant 0 : index
      %c0_12 = arith.constant 0 : index
      %21 = vector.load %arg8[%c0_11, %c0_12] : memref<2x32xf32, #tpu.memory_space<vmem>>, vector<2x32xf32>
      %c0_13 = arith.constant 0 : index
      %c0_14 = arith.constant 0 : index
      %22 = vector.load %arg3[%c0_13, %c0_14] : memref<32x32xf32, #tpu.memory_space<vmem>>, vector<32x32xf32>
      %cst_15 = arith.constant dense<0.000000e+00> : vector<2x32xf32>
      %23 = tpu.matmul %21, %22, %cst_15 {dimension_numbers = #tpu.dot_dimension_numbers<[1], [0], [0], [1], [0, 0, 1, 1], [], []>} : vector<2x32xf32>, vector<32x32xf32>, vector<2x32xf32> -> vector<2x32xf32>
      %c0_16 = arith.constant 0 : index
      %c0_17 = arith.constant 0 : index
      %24 = vector.load %arg4[%c0_16, %c0_17] : memref<1x32xf32, #tpu.memory_space<vmem>>, vector<1x32xf32>
      %25 = vector.broadcast %24 : vector<1x32xf32> to vector<2x32xf32>
      %26 = arith.addf %23, %25 : vector<2x32xf32>
      %cst_18 = arith.constant 0.000000e+00 : f32
      %27 = vector.broadcast %cst_18 : f32 to vector<2x32xf32>
      %28 = arith.maximumf %26, %27 : vector<2x32xf32>
      %c0_19 = arith.constant 0 : index
      %c0_20 = arith.constant 0 : index
      %29 = vector.load %arg5[%c0_19, %c0_20] : memref<32x32xf32, #tpu.memory_space<vmem>>, vector<32x32xf32>
      %cst_21 = arith.constant dense<0.000000e+00> : vector<2x32xf32>
      %30 = tpu.matmul %28, %29, %cst_21 {dimension_numbers = #tpu.dot_dimension_numbers<[1], [0], [0], [1], [0, 0, 1, 1], [], []>} : vector<2x32xf32>, vector<32x32xf32>, vector<2x32xf32> -> vector<2x32xf32>
      %c0_22 = arith.constant 0 : index
      %c0_23 = arith.constant 0 : index
      %31 = vector.load %arg6[%c0_22, %c0_23] : memref<1x32xf32, #tpu.memory_space<vmem>>, vector<1x32xf32>
      %32 = vector.broadcast %31 : vector<1x32xf32> to vector<2x32xf32>
      %33 = arith.addf %30, %32 : vector<2x32xf32>
      %c0_24 = arith.constant 0 : index
      %c0_25 = arith.constant 0 : index
      %34 = vector.load %arg7[%c0_24, %c0_25] : memref<2x32xf32, #tpu.memory_space<vmem>>, vector<2x32xf32>
      tpu.vector_store %arg7[%c0_24, %c0_25], %33 {strides = array<i32>} : memref<2x32xf32, #tpu.memory_space<vmem>>, vector<2x32xf32>,
    } else {
    }
    return
  }
  func.func @transform_0(%arg0: i32) -> (i32, i32) {
    %c0_i32 = arith.constant 0 : i32
    %c0_i32_0 = arith.constant 0 : i32
    %c0_i32_1 = arith.constant 0 : i32
    return %c0_i32, %c0_i32_0 : i32, i32
  }
  func.func @transform_1(%arg0: i32) -> (i32, i32, i32) {
    %c0_i32 = arith.constant 0 : i32
    %c0_i32_0 = arith.constant 0 : i32
    %c0_i32_1 = arith.constant 0 : i32
    return %c0_i32, %arg0, %c0_i32_0 : i32, i32, i32
  }
  func.func @transform_2(%arg0: i32) -> (i32, i32) {
    %c0_i32 = arith.constant 0 : i32
    %c0_i32_0 = arith.constant 0 : i32
    %c0_i32_1 = arith.constant 0 : i32
    return %c0_i32, %c0_i32_0 : i32, i32
  }
  func.func @transform_3(%arg0: i32) -> (i32, i32) {
    %c0_i32 = arith.constant 0 : i32
    %c0_i32_0 = arith.constant 0 : i32
    %c0_i32_1 = arith.constant 0 : i32
    return %c0_i32, %c0_i32_0 : i32, i32
  }
  func.func @transform_4(%arg0: i32) -> (i32, i32) {
    %c0_i32 = arith.constant 0 : i32
    %c0_i32_0 = arith.constant 0 : i32
    %c0_i32_1 = arith.constant 0 : i32
    return %c0_i32, %c0_i32_0 : i32, i32
  }
  func.func @transform_5(%arg0: i32) -> (i32, i32) {
    %c0_i32 = arith.constant 0 : i32
    %c0_i32_0 = arith.constant 0 : i32
    %c0_i32_1 = arith.constant 0 : i32
    return %c0_i32, %c0_i32_0 : i32, i32
  }
  func.func @transform_6(%arg0: i32) -> (i32, i32) {
    %c0_i32 = arith.constant 0 : i32
    %c0_i32_0 = arith.constant 0 : i32
    %c0_i32_1 = arith.constant 0 : i32
    return %c0_i32, %c0_i32_0 : i32, i32
  }
}

</mosaic_0001>

<bundles_post_ra>
// kernel: tpu_custom_call.1
= control target key start
LH: loop header
LB: loop body
LE: loop exit
PB: predicated region body
PF: predicated region fallthrough
CT: control target
= control target key end

     0   :  { %11 = vsyncpa [#allocation5], 0  ;;  %s802_s21 = smov 0   ;;  %s804_s22 = smov 0   ;;  %s924_s0 = inlined_call_operand.vmem [shape: s32[2,1], index: 0, kind: input, shape index: {}]   ;;  %s925_s1 = inlined_call_operand.vmem [shape: f32[2,64,32], index: 1, kind: input, shape index: {}]   ;;  %s926_s2 = inlined_call_operand.vmem [shape: f32[32,32], index: 2, kind: input, shape index: {}]   ;;  %s927_s3 = inlined_call_operand.vmem [shape: f32[1,32], index: 3, kind: input, shape index: {}]   ;;  %s928_s4 = inlined_call_operand.vmem [shape: f32[32,32], index: 4, kind: input, shape index: {}]   ;;  %s929_s5 = inlined_call_operand.vmem [shape: f32[1,32], index: 5, kind: input, shape index: {}]   ;;  %s930_s6 = inlined_call_operand.hbm [shape: f32[2,32], index: 6, kind: output, shape index: {}]  }
   0x1   :  { %s806_s23 = smov 0  }
   0x2 LB: > { %s818_s24 = sadd.s32 4294967295, %s758_s23   ;;  %s821_s25 = sadd.s32 1, %s758_s23   ;;  %s758_s23 = sphi %s806_s23, %s933_s23   ;;  %s754_s22 = sphi %s804_s22, %s932_s22   ;;  %s750_s21 = sphi %s802_s21, %s931_s21  }
   0x3   : > { %s42_s26 = ssub.s32 %s758_s23, %s821_s25  ;;  %s45_s27 = sadd.s32 1, %s754_s22 }
   0x4   : > { %p43_p0 = scmp.eq.s32.totalorder %s42_s26, 0  ;;  %p52_p1 = scmp.ne.s32.totalorder %s754_s22, %s750_s21 }
   0x5   : > { %p53_p2 = scmp.eq.s32.totalorder %s758_s23, 0  ;;  %p605_p4 = scmp.ge.s32.totalorder %s758_s23, 4 }
   0x6   : > { %s830_s28 = scalar_select %p43_p0, %s754_s22, %s45_s27  }
   0x7   : > { %p54_p3 = por %p53_p2, %p52_p1  ;;  %198 = sbr.rel (%p605_p4) target bundleno = 21 (0x15), region = 36 }
   0xe   : > { %201 = sbr.rel (!%p54_p3) target bundleno = 21 (0x15), region = 40  ;;  %s203_s29 = sand.u32 (%p54_p3), 1, %s754_s22  }
   0xf   : > { %s623_s30 = sshll.u32 (%p54_p3), %s758_s23, 4  ;;  %s606_s7 = sshll.u32 (%p54_p3), %s203_s29, 5 }
  0x10   : > { %s208_s10 = scalar_lea.vmem (%p54_p3), %s925_s1, %s623_s30  ;;  %s205_s11 = scalar_lea.vmem (%p54_p3), [#allocation3], %s606_s7 }
  0x11   : > { %v242_v0 = vld [vmem:[%s208_s10] sm:$0xff] (%p54_p3)  ;;  %v244_v1 = vld [vmem:[%s208_s10 + $0x8] sm:$0xff] (%p54_p3) }
  0x12   : > { %v246_v2 = vld [vmem:[%s208_s10 + $0x40] sm:$0xff] (%p54_p3)  ;;  %243 = vst [vmem:[%s205_s11] sm:$0xff] (%p54_p3), %v242_v0  ;;  %245 = vst [vmem:[%s205_s11 + $0x8] sm:$0xff] (%p54_p3), %v244_v1  ;;  %v248_v3 = vld [vmem:[%s208_s10 + $0x48] sm:$0xff] (%p54_p3) }
  0x13   : > { %247 = vst [vmem:[%s205_s11 + $0x10] sm:$0xff] (%p54_p3), %v246_v2  ;;  %249 = vst [vmem:[%s205_s11 + $0x18] sm:$0xff] (%p54_p3), %v248_v3 }
  0x15 PF: > { %p609_p5 = scmp.ge.s32.totalorder %s758_s23, 1  ;;  %p254_p6 = scmp.lt.s32.totalorder %s758_s23, 5 }
  0x17   : > { %p255_p7 = pnand %p609_p5, %p254_p6 }
  0x18   : > { %s261_s12 = sand.u32 (!%p255_p7), 1, %s750_s21   ;;  %p611_p8 = scmp.ne.s32.totalorder (!%p255_p7), %s818_s24, 0 }
  0x19   : > { %258 = sbr.rel (%p255_p7) target bundleno = 666 (0x29a), region = 78  ;;  %s610_s13 = sshll.u32 (!%p255_p7), %s261_s12, 5 }
  0x1a   : > { %s841_s14 = scalar_lea.vmem (!%p255_p7), [#allocation3], %s610_s13 }
  0x20   : > { %289 = sbr.rel (%p611_p8) target bundleno = 39 (0x27), region = 86  ;;  %vm290_vm0 = vcmask (!%p611_p8), 254976   ;;  %v760_v4 = vmov (!%p611_p8), -inf  }
  0x21   : > { %291 = vst.msk [vmem:[#allocation2] sm:$0x3] (!%p611_p8), %vm290_vm0, %v760_v4 }
  0x27 PF: > { %v297_v5 = vlaneseq  ;;  %v761_v6 = vmov 0   ;;  %v762_v8 = vmov 1966171168   ;;  %s612_s17 = sshll.u32 %s818_s24, 4  ;;  %v292_v23 = vld [vmem:[%s841_s14] sm:$0xff]  ;;  %v293_v24 = vld [vmem:[%s841_s14 + $0x8] sm:$0xff] }
  0x28   : > { %705 = vset.pattern.permute.xlu0 %v761_v6  ;;  %v313_v9 = vunpack.c.l.s4 %v762_v8  ;;  %v613_v10 = vld.sshfl [vmem:[%s924_s0] sm:$0x11 pattern:$0x75316420]  ;;  %v300_v20 = vstv %s612_s17  ;;  %vm349_vm1 = vcmask 261120   ;;  %v295_v31 = vld [vmem:[%s841_s14 + $0x18] sm:$0xff] }
  0x29   : > { %v298_v7 = vshrl.u32 %v297_v5, 7  ;;  %v311_v11 = vcombine.high %v613_v10, %v613_v10  ;;  %v294_v30 = vld [vmem:[%s841_s14 + $0x10] sm:$0xff]  ;;  %vm370_vm6 = vcmask 1041409   ;;  %v348_v50 = vld [vmem:[#allocation2] sm:$0x3]  ;;  %vm374_vm7 = vcmask 254976  }
  0x2a   : > { %v314_v12 = vunpack.c.0.s8 %v313_v9  ;;  %p614_p9 = scmp.ne.s32.totalorder %s818_s24, 3 }
  0x2b   : > { %v328_v14 = vsub.s32 0, %v298_v7  ;;  %v299_v19 = vadd.s32 8, %v298_v7  ;;  %v301_v21 = vadd.s32 %v300_v20, %v298_v7  ;;  %v381_v54 = vld [vmem:[%s926_s2] sm:$0xff] (!%p614_p9)  ;;  %v382_v55 = vld [vmem:[%s926_s2 + $0x8] sm:$0xff] (!%p614_p9)  ;;  %v383_v56 = vld [vmem:[%s926_s2 + $0x10] sm:$0xff] (!%p614_p9)  ;;  %v763_v57 = vmov (!%p614_p9), 0.0|0.0  }
  0x2c   : > { %v317_v13 = vsub.s32 %v314_v12, %v298_v7  ;;  %656 = vmatprep.subr.bf16.mxu0 (!%p614_p9), %v763_v57  ;;  %v657_v58 = vpack.c.bf16 (!%p614_p9), %v382_v55, %v381_v54  ;;  %v384_v59 = vld [vmem:[%s926_s2 + $0x18] sm:$0xff] (!%p614_p9)  ;;  %vm764_vm8 = vmmov (!%p614_p9), 0   ;;  %v765_v60 = vmov (!%p614_p9), 0.0   ;;  %v466_v61 = vld [vmem:[%s928_s4] sm:$0xff] (!%p614_p9)  ;;  %662 = vmatprep.subr.bf16.mxu1 (!%p614_p9), %v763_v57  ;;  %v467_v62 = vld [vmem:[%s928_s4 + $0x8] sm:$0xff] (!%p614_p9) }
  0x2d   : > { %v302_v22 = vadd.s32 %v300_v20, %v299_v19  ;;  %642 = vmatprep.mubr.msk.f32.mxu0 (!%p614_p9), %vm764_vm8, %v765_v60  ;;  %653 = vmatprep.mubr.msk.f32.mxu1 (!%p614_p9), %vm764_vm8, %v765_v60  ;;  %v660_v63 = vpack.c.bf16 (!%p614_p9), %v384_v59, %v383_v56  ;;  %v663_v0 = vpack.c.bf16 (!%p614_p9), %v467_v62, %v466_v61  ;;  %v468_v2 = vld [vmem:[%s928_s4 + $0x10] sm:$0xff] (!%p614_p9)  ;;  %v469_v3 = vld [vmem:[%s928_s4 + $0x18] sm:$0xff] (!%p614_p9)  ;;  %v615_v5 = vld [vmem:[%s927_s3] ss:$0 sm:$0xff] (!%p614_p9) }
  0x2e   : > { %v318_v15 = vrot.slane %v613_v10, %v317_v13  ;;  %v325_v16 = vrot.slane %v311_v11, %v317_v13  ;;  %658 = vmatpush3.bf16.msra.mxu0 (!%p614_p9), %v657_v58  ;;  %v666_v4 = vpack.c.bf16 (!%p614_p9), %v469_v3, %v468_v2  ;;  %v617_v10 = vld [vmem:[%s929_s5] ss:$0 sm:$0xff] (!%p614_p9) }
  0x2f   : > { %659 = vmatprep.subr.bf16.mxu0 (!%p614_p9), %v763_v57  ;;  %664 = vmatpush3.bf16.msra.mxu1 (!%p614_p9), %v663_v0 }
  0x30   : > { %v329_v17 = vrot.slane %v318_v15, %v328_v14  ;;  %v333_v18 = vrot.slane %v325_v16, %v328_v14  ;;  %665 = vmatprep.subr.bf16.mxu1 (!%p614_p9), %v763_v57 }
  0x32   : > { %335 = vperm.xlu0 %705, %v329_v17   ;;  %661 = vmatpush3.bf16.msra.mxu0 (!%p614_p9), %v660_v63 }
  0x33   : > { %667 = vmatpush3.bf16.msra.mxu1 (!%p614_p9), %v666_v4 }
  0x36   : > { %338 = vperm.xlu0 %705, %v333_v18  }
  0xb1   : > { %v336_v25 = vpop.permute.xlu0 %335 }
  0xb2   : > { %vm340_vm2 = vcmp.lt.s32.totalorder %v301_v21, %v336_v25  ;;  %vm341_vm3 = vcmp.lt.s32.totalorder %v302_v22, %v336_v25 }
  0xb3   : > { %v344_v26 = vsel %vm340_vm2, %v292_v23, -inf  ;;  %v345_v27 = vsel %vm341_vm3, %v293_v24, -inf }
  0xb4   : > { %v350_v28 = vsel %vm349_vm1, %v344_v26, -inf  ;;  %v351_v29 = vsel %vm349_vm1, %v345_v27, -inf }
  0xb5   : > { %v352_v32 = vmax.f32 %v350_v28, %v351_v29  ;;  %v339_v33 = vpop.permute.xlu0 %338 }
  0xb6   : > { %vm342_vm4 = vcmp.lt.s32.totalorder %v301_v21, %v339_v33  ;;  %vm343_vm5 = vcmp.lt.s32.totalorder %v302_v22, %v339_v33 }
  0xb7   : > { %v353_v34 = vrot.slane %v352_v32, 4  ;;  %v346_v35 = vsel %vm342_vm4, %v294_v30, -inf  ;;  %v347_v36 = vsel %vm343_vm5, %v295_v31, -inf }
  0xb8   : > { %v359_v37 = vsel %vm349_vm1, %v346_v35, -inf  ;;  %v360_v38 = vsel %vm349_vm1, %v347_v36, -inf }
  0xb9   : > { %v354_v39 = vmax.f32 %v352_v32, %v353_v34  ;;  %v361_v40 = vmax.f32 %v359_v37, %v360_v38 }
  0xbb   : > { %v355_v41 = vrot.slane %v354_v39, 2  ;;  %v362_v42 = vrot.slane %v361_v40, 4 }
  0xbd   : > { %v356_v43 = vmax.f32 %v354_v39, %v355_v41  ;;  %v363_v44 = vmax.f32 %v361_v40, %v362_v42 }
  0xbf   : > { %v364_v45 = vrot.slane %v363_v44, 2  ;;  %v357_v46 = vrot.slane %v356_v43, 1 }
  0xc1   : > { %v365_v47 = vmax.f32 %v363_v44, %v364_v45  ;;  %v358_v49 = vmax.f32 %v356_v43, %v357_v46 }
  0xc3   : > { %v366_v48 = vrot.slane %v365_v47, 1 }
  0xc4   : > { %379 = sbr.rel (%p614_p9) target bundleno = 641 (0x281), region = 90 }
  0xc5   : > { %v367_v51 = vmax.f32 %v365_v47, %v366_v48 }
  0xc7   : > { %v371_v52 = vsel %vm370_vm6, %v367_v51, %v358_v49 }
  0xc8   : > { %v373_v53 = vmax.f32 %v348_v50, %v371_v52 }
  0xca   : > { %375 = vst.msk [vmem:[#allocation2] sm:$0x3] %vm374_vm7, %v373_v53 }
  0xd1   : > { %v380_v1 = vld [vmem:[#allocation2] sm:$0x3] }
  0xd2   : > { %643 = vmatmul.mubr.msk.f32.vlgmr.msra.gmra.mrb[0].mxu0 %vm349_vm1, %v380_v1 }
 0x1a5   : > { %v461_v6 = vpop.f32.mrb[0].mxu0 }
 0x1a6   : > { %v462_v7 = vadd.f32 %v615_v5, %v461_v6  ;;  %v644_v8 = vpop.f32.mrb[1].mxu0 }
 0x1a8   : > { %v465_v9 = vmax.f32 %v462_v7, 0.0 }
 0x1aa   : > { %654 = vmatmul.mubr.msk.f32.vlgmr.msra.gmra.mrb[0].mxu1 %vm349_vm1, %v465_v9 }
 0x27d   : > { %v546_v11 = vpop.f32.mrb[0].mxu1 }
 0x27e   : > { %v547_v12 = vadd.f32 %v617_v10, %v546_v11  ;;  %v655_v13 = vpop.f32.mrb[1].mxu1 }
 0x280   : > { %550 = vst.msk [vmem:[#allocation4] sm:$0x3] %vm374_vm7, %v547_v12 }
 0x281 PF: > { %p672_p10 = scmp.eq.s32.totalorder %s818_s24, 3  ;;  %s766_s18 = smov [#allocation4]  }
 0x282   : > { %s558_s19 = sshll.u32 %s766_s18, 4  ;;  %s559_s19 = int_to_ptr.vmem [resolvable:$true] %s558_s19 }
 0x283   : > { %s706_s20 = scalar_lea.vmem %s559_s19, 32  ;;  %p713_p0 = scmp.lt.s32.totalorder %s559_s19, %s559_s19 }
 0x284   : > { %p707_p11 = scmp.ne.s32.totalorder %s559_s19, %s706_s20  ;;  %p714_p1 = scmp.lt.s32.totalorder %s706_s20, %s706_s20 }
 0x286   : > { %p708_p12 = pnand %p707_p11, %p672_p10  ;;  %p715_p2 = por %p714_p1, %p713_p0 }
 0x288   : > { %p709_p13 = pneg %p708_p12 }
 0x28a   : > { %p716_p3 = pnand %p715_p2, %p709_p13 }
 0x28c   : > { %719 = shalt.err (!%p716_p3)
}
 0x28d   : > { %s720_s26 = scalar_lea.hbm %s930_s6, 32 }
 0x28e   : > { %p721_p4 = scmp.ne.s32.totalorder %s930_s6, %s720_s26  ;;  %p726_p7 = scmp.lt.u32.totalorder %s720_s26, %s930_s6 }
 0x290   : > { %p722_p5 = pnand %p721_p4, %p672_p10 }
 0x292   : > { %p723_p6 = pneg %p722_p5 }
 0x294   : > { %p728_p8 = pnand %p726_p7, %p723_p6 }
 0x296   : > { %731 = shalt.err (!%p728_p8)
}
 0x297   : > { %669 = dma.vmem_to_hbm [thread:$0]  (%p672_p10), %s559_s19, 32, %s930_s6, [#allocation5]  }
 0x298   : > { %745 = dma.done.wait (%p672_p10), [#allocation5], 32  }
 0x299   : > { %747 = vsyncadd (%p672_p10), [#allocation5], 4294967264 }
 0x29a PF: > { %p14_p9 = scmp.ge.s32.totalorder %s821_s25, 6   ;;  %s931_s21 = smov %s754_s22 }
 0x29b   : > { %s932_s22 = smov %s830_s28  ;;  %s933_s23 = smov %s821_s25 }
 0x29c   :  { %16 = sbr.rel (!%p14_p9) target bundleno = 2 (0x2), region = 122 }
 0x2a3   :  { %571 = vsyncpa [#allocation5], 1 }
 0x2a4   :  { %573 = vsyncpa [#allocation5 + $0x1], 1 }

</bundles_post_ra>
